<compile_context>
chip_gen: v7x
topology: tpu7x:2x2x1
jax: 0.10.0
libtpu: 0.0.40
codegen_flags: <defaults>
</compile_context>

<pallas_src>
import functools

import jax
import jax.numpy as jnp
from jax.experimental import pallas as pl

OUT_LANES = 128   # lane-dense packed output width: [enc | logits | zero pad]
IN_LANES = 8      # one-hot width of the first matmul (vocab lanes + const-1 bias lane)


def _silu(x):
    return x * jax.nn.sigmoid(x)


# ----------------------------------------------------------------------------
# Single fused kernel: MambaBlock1 + fc_task + classifier for the whole batch.
# Inputs: token ids (B*L, 1) int32 and one packed weight slab.  No grid.
# ----------------------------------------------------------------------------
def fused_mamba_kernel(tok_ref, w_ref, out_ref, *, offs, d_model, state_size, vocab):
    D, N = d_model, state_size
    F = 2 * D
    BL = tok_ref.shape[0]

    def blk(name):                      # static slice of the weight slab (view+load)
        r, h, w = offs[name]
        return w_ref[r:r + h, 0:w]

    def bias(row, width):               # one bias per row of the "bias" block
        r, _, _ = offs["bias"]
        return w_ref[r + row:r + row + 1, 0:width]

    # One-hot of the token ids built in-kernel (embedding folded into the first
    # matmul host-side); lane `vocab` is a constant 1 carrying the fused bias row.
    tok = tok_ref[...]                                              # (BL, 1) int32
    lane = jax.lax.broadcasted_iota(jnp.int32, (BL, IN_LANES), 1)
    oh = jnp.where(lane == vocab, 1.0, (tok == lane).astype(jnp.float32))

    # emb -> [inp_proj | left-shift tap | right-shift tap | residual D-proj] (+ bias)
    xi = jnp.dot(oh, blk("w_in"), preferred_element_type=jnp.float32)   # (BL, 4F)
    x_proj = xi[:, 0 * F:1 * F]
    x_left = xi[:, 1 * F:2 * F]     # col f holds x_proj[:, f-1] (zero at f=0)
    x_right = xi[:, 2 * F:3 * F]    # col f holds x_proj[:, f+1] (zero at f=F-1)
    x_res = _silu(xi[:, 3 * F:4 * F])

    # Conv1d(seq_len -> seq_len, k=3, pad=1) over the feature axis, batch
    # block-diagonal; three tap matmuls summed (no sublane concat).
    x_conv = (jnp.dot(blk("wc0"), x_left, preferred_element_type=jnp.float32)
              + jnp.dot(blk("wc1"), x_proj, preferred_element_type=jnp.float32)
              + jnp.dot(blk("wc2"), x_right, preferred_element_type=jnp.float32)
              + blk("b_conv"))

    x_conv_out = (jnp.dot(_silu(x_conv), blk("wcl"),
                          preferred_element_type=jnp.float32) + bias(0, F))

    # S6 (degenerate: h initialized to zero, no recurrence in the reference forward)
    s6 = (jnp.dot(x_conv_out, blk("w_s6"), preferred_element_type=jnp.float32)
          + bias(1, F + 2 * N))                                     # [delta | B | C]
    delta = jax.nn.softplus(s6[:, :F])
    Bm = s6[:, F:F + N]
    Cm = s6[:, F + N:F + 2 * N]
    cb_sum = jnp.sum(Bm * Cm, axis=-1, keepdims=True)               # (BL, 1)
    y_ssm = x_conv_out * delta * cb_sum                             # (BL, F)

    x_comb = _silu(y_ssm) * x_res                                   # (BL, F)

    # out_proj folded into fc_task.linear1: hr[r, l*D:(l+1)*D] = blk[r] @ t_w1_block_l.
    # Keep only the block matching each row's sequence position, collapse the L
    # lane-blocks with the block-sum matrix, then sum the L rows per batch element.
    hr = jnp.dot(x_comb, blk("w_flat"), preferred_element_type=jnp.float32)  # (BL, L*D)
    hr = hr * blk("flat_mask")
    h_rows = jnp.dot(hr, blk("rsum"), preferred_element_type=jnp.float32)    # (BL, D)
    h = (jnp.dot(blk("sum_mat"), h_rows, preferred_element_type=jnp.float32)
         + bias(2, D))                                              # (B, D)

    # BatchNorm1d, training-mode forward (batch mean / biased variance) + LeakyReLU.
    mean = jnp.mean(h, axis=0, keepdims=True)
    var = jnp.mean((h - mean) ** 2, axis=0, keepdims=True)
    h = (h - mean) * jax.lax.rsqrt(var + 1e-5) * bias(3, D) + bias(4, D)
    h = jnp.where(h >= 0, h, 0.01 * h)

    # fc_task.linear2 + classifier fused into one lane-dense (D, 128) head matmul;
    # single unmasked full-width store of [enc | logits | zero pad].
    out_ref[...] = (jnp.dot(h, blk("w_head"), preferred_element_type=jnp.float32)
                    + bias(5, out_ref.shape[1]))


# ----------------------------------------------------------------------------
# Host-side one-time weight fusion + slab packing.
# ----------------------------------------------------------------------------
def _pack_slab(blocks):
    """Stack 2D blocks into one lane-dense (rows, width) slab.

    Every block starts at a multiple of 8 rows; width = max block width rounded
    up to 128 lanes.  Returns (slab, {name: (row_start, nrows, ncols)}).
    """
    width = max(int(a.shape[1]) for _, a in blocks)
    width = ((width + 127) // 128) * 128
    offs, parts, r = {}, [], 0
    for name, a in blocks:
        a = jnp.asarray(a, jnp.float32)
        h, w = int(a.shape[0]), int(a.shape[1])
        hp = ((h + 7) // 8) * 8
        parts.append(jnp.zeros((hp, width), jnp.float32).at[:h, :w].set(a))
        offs[name] = (r, h, w)
        r += hp
    return jnp.concatenate(parts, axis=0), offs


def fuse_params(params, batch, vocab=5):
    p = params
    D = p["wip"].shape[0]
    F = 2 * D
    L = p["cw0"].shape[0]
    N = p["wf2"].shape[1]
    BL = batch * L
    assert vocab < IN_LANES
    f32 = jnp.float32

    # Exact 0/1 feature-shift matrices: (x @ s_left)[:, f] = x[:, f-1], etc.
    s_left = jnp.eye(F, k=1, dtype=f32)
    s_right = jnp.eye(F, k=-1, dtype=f32)

    # Embedding folded into [inp_proj | left tap | right tap | residual D-proj];
    # the input bias rides on the extra constant-1 lane (row `vocab`).
    w_in_cat = jnp.concatenate(
        [p["wip"], p["wip"] @ s_left, p["wip"] @ s_right, p["wd"]], axis=1)
    b_in_cat = jnp.concatenate(
        [p["bip"], p["bip"] @ s_left, p["bip"] @ s_right, p["bd"]], axis=1)
    w_in = jnp.zeros((IN_LANES, 4 * F), f32)
    w_in = w_in.at[:vocab, :].set(p["emb"] @ w_in_cat)
    w_in = w_in.at[vocab, :].set(b_in_cat[0])

    # Conv taps, batch block-diagonal; bias pre-broadcast to (B*L, F).
    eye_b = jnp.eye(batch, dtype=f32)
    wc0 = jnp.kron(eye_b, p["cw0"])
    wc1 = jnp.kron(eye_b, p["cw1"])
    wc2 = jnp.kron(eye_b, p["cw2"])
    b_conv = jnp.tile(jnp.tile(p["cb"], (batch, 1)), (1, F))

    # S6 fc1|fc2|fc3 fused.
    w_s6 = jnp.concatenate([p["wf1"], p["wf2"], p["wf3"]], axis=1)
    b_s6 = jnp.concatenate([p["bf1"], p["bf2"], p["bf3"]], axis=1)

    # out_proj folded into fc_task.linear1: block l = wop @ t_w1[l*D:(l+1)*D].
    t1 = p["t_w1"].reshape(L, D, D)
    w_flat = jnp.einsum("ik,lko->ilo", p["wop"], t1).reshape(F, L * D)
    t_b1 = p["t_b1"] + jnp.tile(p["bop"], (1, L)) @ p["t_w1"]

    rows = jnp.arange(BL)
    cols = jnp.arange(L * D)
    flat_mask = ((cols[None, :] // D) == (rows[:, None] % L)).astype(f32)
    rsum = jnp.tile(jnp.eye(D, dtype=f32), (L, 1))          # (L*D, D) block-sum
    sum_mat = ((rows[None, :] // L) == jnp.arange(batch)[:, None]).astype(f32)

    # fc_task.linear2 + classifier fused, lane-dense padded to OUT_LANES.
    w_head = jnp.zeros((D, OUT_LANES), f32)
    w_head = w_head.at[:, :D // 2].set(p["t_w2"])
    w_head = w_head.at[:, D // 2:D // 2 + 2].set(p["t_w2"] @ p["c_w"])
    b_head = jnp.zeros((1, OUT_LANES), f32)
    b_head = b_head.at[:, :D // 2].set(p["t_b2"])
    b_head = b_head.at[:, D // 2:D // 2 + 2].set(p["t_b2"] @ p["c_w"] + p["c_b"])

    # All remaining biases, one per row of a single (8, width) block.
    wb = max(F, F + 2 * N, D, OUT_LANES)
    bias = jnp.zeros((8, wb), f32)
    bias = bias.at[0, :F].set(p["bcl"][0])
    bias = bias.at[1, :F + 2 * N].set(b_s6[0])
    bias = bias.at[2, :D].set(t_b1[0])
    bias = bias.at[3, :D].set(p["bn_w"][0])
    bias = bias.at[4, :D].set(p["bn_b"][0])
    bias = bias.at[5, :OUT_LANES].set(b_head[0])

    slab, offs = _pack_slab([
        ("w_in", w_in), ("wc0", wc0), ("wc1", wc1), ("wc2", wc2),
        ("b_conv", b_conv), ("wcl", p["wcl"]), ("w_s6", w_s6),
        ("w_flat", w_flat), ("flat_mask", flat_mask), ("rsum", rsum),
        ("sum_mat", sum_mat), ("w_head", w_head), ("bias", bias),
    ])

    return {"slab": slab, "offs": offs, "d_model": D, "state_size": N,
            "vocab": vocab, "enc_dim": D // 2}


# ----------------------------------------------------------------------------
# Forward wrapper: token reshape + one fused pallas_call (2 inputs total).
# ----------------------------------------------------------------------------
def mamba_forward(tokens, slab, meta):
    B, L = tokens.shape
    tok = tokens.reshape(B * L, 1).astype(jnp.int32)

    kernel = functools.partial(
        fused_mamba_kernel, offs=meta["offs"], d_model=meta["d_model"],
        state_size=meta["state_size"], vocab=meta["vocab"])

    # No grid / no BlockSpecs: both operands are mapped whole into VMEM
    # (total footprint < 1 MiB on all TPU generations).
    packed = pl.pallas_call(
        kernel,
        out_shape=jax.ShapeDtypeStruct((B, OUT_LANES), jnp.float32),
    )(tok, slab)

    enc_dim = meta["enc_dim"]
    enc = packed[:, :enc_dim]
    logits = packed[:, enc_dim:enc_dim + 2]
    return logits, enc


# ----------------------------------------------------------------------------
# Deterministic parameter init (same scheme as the previously validated version;
# Linear weights stored pre-transposed as (in, out)).
# ----------------------------------------------------------------------------
def init_params(key, seq_len, d_model, state_size):
    D, L, N = d_model, seq_len, state_size
    F = 2 * D
    ks = iter(jax.random.split(key, 32))

    def lin(kin, kout, scale=None):
        s = scale if scale is not None else 1.0 / jnp.sqrt(kin)
        return jax.random.normal(next(ks), (kin, kout), jnp.float32) * s

    p = {}
    p["emb"] = jax.random.normal(next(ks), (5, D), jnp.float32)
    # MambaBlock1
    p["wip"], p["bip"] = lin(D, F), jnp.zeros((1, F), jnp.float32)
    conv_w = jax.random.normal(next(ks), (L, L, 3), jnp.float32) * (1.0 / jnp.sqrt(3 * L))
    p["cw0"], p["cw1"], p["cw2"] = conv_w[:, :, 0], conv_w[:, :, 1], conv_w[:, :, 2]
    p["cb"] = jnp.zeros((L, 1), jnp.float32)
    p["wcl"], p["bcl"] = lin(F, F), jnp.zeros((1, F), jnp.float32)
    p["wf1"], p["bf1"] = lin(F, F), jnp.zeros((1, F), jnp.float32)
    p["wf2"], p["bf2"] = lin(F, N), jnp.zeros((1, N), jnp.float32)
    p["wf3"], p["bf3"] = lin(F, N), jnp.zeros((1, N), jnp.float32)
    p["wd"], p["bd"] = lin(D, F), jnp.zeros((1, F), jnp.float32)
    p["wop"], p["bop"] = lin(F, D), jnp.ones((1, D), jnp.float32)  # bias init 1.0
    # fc_task + classifier
    p["t_w1"], p["t_b1"] = lin(D * L, D), jnp.zeros((1, D), jnp.float32)
    p["bn_w"], p["bn_b"] = jnp.ones((1, D), jnp.float32), jnp.zeros((1, D), jnp.float32)
    p["t_w2"], p["t_b2"] = lin(D, D // 2), jnp.zeros((1, D // 2), jnp.float32)
    p["c_w"], p["c_b"] = lin(D // 2, 2), jnp.zeros((1, 2), jnp.float32)
    return p


if __name__ == "__main__":
    seq_len, d_model, state_size = 8, 32, 16
    batch = 2

    key = jax.random.PRNGKey(0)
    k_tok, k_par = jax.random.split(key)
    params = init_params(k_par, seq_len, d_model, state_size)
    fused = fuse_params(params, batch)          # one-time host-side weight fusion
    slab = fused["slab"]
    meta = {k: v for k, v in fused.items() if k != "slab"}
    tokens = jax.random.randint(k_tok, (batch, seq_len), 0, 5, dtype=jnp.int32)

    forward = jax.jit(functools.partial(mamba_forward, meta=meta))
    logits, enc = forward(tokens, slab)
    jax.block_until_ready((logits, enc))

    assert logits.shape == (batch, 2)
    assert enc.shape == (batch, d_model // 2)
    assert bool(jnp.all(jnp.isfinite(logits))) and bool(jnp.all(jnp.isfinite(enc)))
    print("KERNEL_OK")
</pallas_src>

<mosaic_0001>
module attributes {stable_mosaic.version = 11 : i64} {
  func.func @fused_mamba_kernel(%arg0: memref<16x1xi32, #tpu.memory_space<vmem>>, %arg1: memref<584x256xf32, #tpu.memory_space<vmem>>, %arg2: memref<2x128xf32, #tpu.memory_space<vmem>>) attributes {dimension_semantics = [], scalar_prefetch = 0 : i64, scratch_operands = 0 : i64, tpu.core_type = #tpu.core_type<tc>} {
    %c0 = arith.constant 0 : index
    %c0_0 = arith.constant 0 : index
    %0 = vector.load %arg0[%c0, %c0_0] : memref<16x1xi32, #tpu.memory_space<vmem>>, vector<16x1xi32>
    %1 = tpu.iota {dimensions = array<i32: 1>} : vector<16x8xi32>
    %c5_i32 = arith.constant 5 : i32
    %2 = vector.broadcast %c5_i32 : i32 to vector<16x8xi32>
    %3 = arith.cmpi eq, %1, %2 : vector<16x8xi32>
    %4 = vector.broadcast %0 : vector<16x1xi32> to vector<16x8xi32>
    %5 = arith.cmpi eq, %4, %1 : vector<16x8xi32>
    %6 = arith.extui %5 : vector<16x8xi1> to vector<16x8xi32>
    %7 = arith.sitofp %6 : vector<16x8xi32> to vector<16x8xf32>
    %cst = arith.constant 1.000000e+00 : f32
    %8 = vector.broadcast %cst : f32 to vector<16x8xf32>
    %9 = arith.select %3, %8, %7 : vector<16x8xi1>, vector<16x8xf32>
    %c0_1 = arith.constant 0 : index
    %c0_2 = arith.constant 0 : index
    %10 = vector.load %arg1[%c0_1, %c0_2] : memref<584x256xf32, #tpu.memory_space<vmem>>, vector<8x256xf32>
    %cst_3 = arith.constant dense<0.000000e+00> : vector<16x256xf32>
    %11 = tpu.matmul %9, %10, %cst_3 {dimension_numbers = #tpu.dot_dimension_numbers<[1], [0], [0], [1], [0, 0, 1, 1], [], []>} : vector<16x8xf32>, vector<8x256xf32>, vector<16x256xf32> -> vector<16x256xf32>
    %12 = vector.extract_strided_slice %11 {offsets = [0, 0], sizes = [16, 64], strides = [1, 1]} : vector<16x256xf32> to vector<16x64xf32>
    %13 = vector.extract_strided_slice %11 {offsets = [0, 64], sizes = [16, 64], strides = [1, 1]} : vector<16x256xf32> to vector<16x64xf32>
    %14 = vector.extract_strided_slice %11 {offsets = [0, 128], sizes = [16, 64], strides = [1, 1]} : vector<16x256xf32> to vector<16x64xf32>
    %15 = vector.extract_strided_slice %11 {offsets = [0, 192], sizes = [16, 64], strides = [1, 1]} : vector<16x256xf32> to vector<16x64xf32>
    %16 = arith.negf %15 : vector<16x64xf32>
    %17 = math.exp %16 : vector<16x64xf32>
    %cst_4 = arith.constant 1.000000e+00 : f32
    %18 = vector.broadcast %cst_4 : f32 to vector<16x64xf32>
    %19 = arith.addf %18, %17 : vector<16x64xf32>
    %20 = arith.divf %18, %19 : vector<16x64xf32>
    %21 = arith.mulf %15, %20 : vector<16x64xf32>
    %c8 = arith.constant 8 : index
    %c0_5 = arith.constant 0 : index
    %22 = vector.load %arg1[%c8, %c0_5] : memref<584x256xf32, #tpu.memory_space<vmem>>, vector<16x16xf32>
    %cst_6 = arith.constant dense<0.000000e+00> : vector<16x64xf32>
    %23 = tpu.matmul %22, %13, %cst_6 {dimension_numbers = #tpu.dot_dimension_numbers<[1], [0], [0], [1], [0, 0, 1, 1], [], []>} : vector<16x16xf32>, vector<16x64xf32>, vector<16x64xf32> -> vector<16x64xf32>
    %c24 = arith.constant 24 : index
    %c0_7 = arith.constant 0 : index
    %24 = vector.load %arg1[%c24, %c0_7] : memref<584x256xf32, #tpu.memory_space<vmem>>, vector<16x16xf32>
    %cst_8 = arith.constant dense<0.000000e+00> : vector<16x64xf32>
    %25 = tpu.matmul %24, %12, %cst_8 {dimension_numbers = #tpu.dot_dimension_numbers<[1], [0], [0], [1], [0, 0, 1, 1], [], []>} : vector<16x16xf32>, vector<16x64xf32>, vector<16x64xf32> -> vector<16x64xf32>
    %26 = arith.addf %23, %25 : vector<16x64xf32>
    %c40 = arith.constant 40 : index
    %c0_9 = arith.constant 0 : index
    %27 = vector.load %arg1[%c40, %c0_9] : memref<584x256xf32, #tpu.memory_space<vmem>>, vector<16x16xf32>
    %cst_10 = arith.constant dense<0.000000e+00> : vector<16x64xf32>
    %28 = tpu.matmul %27, %14, %cst_10 {dimension_numbers = #tpu.dot_dimension_numbers<[1], [0], [0], [1], [0, 0, 1, 1], [], []>} : vector<16x16xf32>, vector<16x64xf32>, vector<16x64xf32> -> vector<16x64xf32>
    %29 = arith.addf %26, %28 : vector<16x64xf32>
    %c56 = arith.constant 56 : index
    %c0_11 = arith.constant 0 : index
    %30 = vector.load %arg1[%c56, %c0_11] : memref<584x256xf32, #tpu.memory_space<vmem>>, vector<16x64xf32>
    %31 = arith.addf %29, %30 : vector<16x64xf32>
    %32 = arith.negf %31 : vector<16x64xf32>
    %33 = math.exp %32 : vector<16x64xf32>
    %cst_12 = arith.constant 1.000000e+00 : f32
    %34 = vector.broadcast %cst_12 : f32 to vector<16x64xf32>
    %35 = arith.addf %34, %33 : vector<16x64xf32>
    %36 = arith.divf %34, %35 : vector<16x64xf32>
    %37 = arith.mulf %31, %36 : vector<16x64xf32>
    %c72 = arith.constant 72 : index
    %c0_13 = arith.constant 0 : index
    %38 = vector.load %arg1[%c72, %c0_13] : memref<584x256xf32, #tpu.memory_space<vmem>>, vector<64x64xf32>
    %cst_14 = arith.constant dense<0.000000e+00> : vector<16x64xf32>
    %39 = tpu.matmul %37, %38, %cst_14 {dimension_numbers = #tpu.dot_dimension_numbers<[1], [0], [0], [1], [0, 0, 1, 1], [], []>} : vector<16x64xf32>, vector<64x64xf32>, vector<16x64xf32> -> vector<16x64xf32>
    %c576 = arith.constant 576 : index
    %c0_15 = arith.constant 0 : index
    %40 = vector.load %arg1[%c576, %c0_15] : memref<584x256xf32, #tpu.memory_space<vmem>>, vector<1x64xf32>
    %41 = vector.broadcast %40 : vector<1x64xf32> to vector<16x64xf32>
    %42 = arith.addf %39, %41 : vector<16x64xf32>
    %c136 = arith.constant 136 : index
    %c0_16 = arith.constant 0 : index
    %43 = vector.load %arg1[%c136, %c0_16] : memref<584x256xf32, #tpu.memory_space<vmem>>, vector<64x96xf32>
    %cst_17 = arith.constant dense<0.000000e+00> : vector<16x96xf32>
    %44 = tpu.matmul %42, %43, %cst_17 {dimension_numbers = #tpu.dot_dimension_numbers<[1], [0], [0], [1], [0, 0, 1, 1], [], []>} : vector<16x64xf32>, vector<64x96xf32>, vector<16x96xf32> -> vector<16x96xf32>
    %c577 = arith.constant 577 : index
    %c0_18 = arith.constant 0 : index
    %45 = vector.load %arg1[%c577, %c0_18] : memref<584x256xf32, #tpu.memory_space<vmem>>, vector<1x96xf32>
    %46 = vector.broadcast %45 : vector<1x96xf32> to vector<16x96xf32>
    %47 = arith.addf %44, %46 : vector<16x96xf32>
    %48 = vector.extract_strided_slice %47 {offsets = [0, 0], sizes = [16, 64], strides = [1, 1]} : vector<16x96xf32> to vector<16x64xf32>
    %cst_19 = arith.constant 0.000000e+00 : f32
    %49 = vector.broadcast %cst_19 : f32 to vector<16x64xf32>
    %50 = arith.maximumf %48, %49 : vector<16x64xf32>
    %51 = vector.broadcast %cst_19 : f32 to vector<16x64xf32>
    %52 = arith.subf %48, %51 : vector<16x64xf32>
    %53 = arith.cmpf one, %52, %52 : vector<16x64xf32>
    %54 = vector.broadcast %cst_19 : f32 to vector<16x64xf32>
    %55 = arith.addf %48, %54 : vector<16x64xf32>
    %56 = math.absf %52 : vector<16x64xf32>
    %cst_20 = arith.constant 0.000000e+00 : f32
    %57 = vector.broadcast %cst_20 : f32 to vector<16x64xf32>
    %58 = arith.subf %57, %56 : vector<16x64xf32>
    %59 = math.exp %58 : vector<16x64xf32>
    %60 = math.log1p %59 : vector<16x64xf32>
    %61 = arith.addf %50, %60 : vector<16x64xf32>
    %62 = arith.select %53, %55, %61 : vector<16x64xi1>, vector<16x64xf32>
    %63 = vector.extract_strided_slice %47 {offsets = [0, 64], sizes = [16, 16], strides = [1, 1]} : vector<16x96xf32> to vector<16x16xf32>
    %64 = vector.extract_strided_slice %47 {offsets = [0, 80], sizes = [16, 16], strides = [1, 1]} : vector<16x96xf32> to vector<16x16xf32>
    %65 = arith.mulf %63, %64 : vector<16x16xf32>
    %cst_21 = arith.constant dense<0.000000e+00> : vector<16xf32>
    %66 = vector.multi_reduction <add>, %65, %cst_21 [1] : vector<16x16xf32> to vector<16xf32>
    %67 = vector.shape_cast %66 : vector<16xf32> to vector<16x1xf32>
    %68 = arith.mulf %42, %62 : vector<16x64xf32>
    %69 = vector.broadcast %67 : vector<16x1xf32> to vector<16x64xf32>
    %70 = arith.mulf %68, %69 : vector<16x64xf32>
    %71 = arith.negf %70 : vector<16x64xf32>
    %72 = math.exp %71 : vector<16x64xf32>
    %cst_22 = arith.constant 1.000000e+00 : f32
    %73 = vector.broadcast %cst_22 : f32 to vector<16x64xf32>
    %74 = arith.addf %73, %72 : vector<16x64xf32>
    %75 = arith.divf %73, %74 : vector<16x64xf32>
    %76 = arith.mulf %70, %75 : vector<16x64xf32>
    %77 = arith.mulf %76, %21 : vector<16x64xf32>
    %c200 = arith.constant 200 : index
    %c0_23 = arith.constant 0 : index
    %78 = vector.load %arg1[%c200, %c0_23] : memref<584x256xf32, #tpu.memory_space<vmem>>, vector<64x256xf32>
    %cst_24 = arith.constant dense<0.000000e+00> : vector<16x256xf32>
    %79 = tpu.matmul %77, %78, %cst_24 {dimension_numbers = #tpu.dot_dimension_numbers<[1], [0], [0], [1], [0, 0, 1, 1], [], []>} : vector<16x64xf32>, vector<64x256xf32>, vector<16x256xf32> -> vector<16x256xf32>
    %c264 = arith.constant 264 : index
    %c0_25 = arith.constant 0 : index
    %80 = vector.load %arg1[%c264, %c0_25] : memref<584x256xf32, #tpu.memory_space<vmem>>, vector<16x256xf32>
    %81 = arith.mulf %79, %80 : vector<16x256xf32>
    %c280 = arith.constant 280 : index
    %c0_26 = arith.constant 0 : index
    %82 = vector.load %arg1[%c280, %c0_26] : memref<584x256xf32, #tpu.memory_space<vmem>>, vector<256x32xf32>
    %cst_27 = arith.constant dense<0.000000e+00> : vector<16x32xf32>
    %83 = tpu.matmul %81, %82, %cst_27 {dimension_numbers = #tpu.dot_dimension_numbers<[1], [0], [0], [1], [0, 0, 1, 1], [], []>} : vector<16x256xf32>, vector<256x32xf32>, vector<16x32xf32> -> vector<16x32xf32>
    %c536 = arith.constant 536 : index
    %c0_28 = arith.constant 0 : index
    %84 = vector.load %arg1[%c536, %c0_28] : memref<584x256xf32, #tpu.memory_space<vmem>>, vector<2x16xf32>
    %cst_29 = arith.constant dense<0.000000e+00> : vector<2x32xf32>
    %85 = tpu.matmul %84, %83, %cst_29 {dimension_numbers = #tpu.dot_dimension_numbers<[1], [0], [0], [1], [0, 0, 1, 1], [], []>} : vector<2x16xf32>, vector<16x32xf32>, vector<2x32xf32> -> vector<2x32xf32>
    %c578 = arith.constant 578 : index
    %c0_30 = arith.constant 0 : index
    %86 = vector.load %arg1[%c578, %c0_30] : memref<584x256xf32, #tpu.memory_space<vmem>>, vector<1x32xf32>
    %87 = vector.broadcast %86 : vector<1x32xf32> to vector<2x32xf32>
    %88 = arith.addf %85, %87 : vector<2x32xf32>
    %cst_31 = arith.constant dense<0.000000e+00> : vector<32xf32>
    %89 = vector.multi_reduction <add>, %88, %cst_31 [0] : vector<2x32xf32> to vector<32xf32>
    %90 = vector.shape_cast %89 : vector<32xf32> to vector<1x32xf32>
    %cst_32 = arith.constant 2.000000e+00 : f32
    %91 = vector.broadcast %cst_32 : f32 to vector<1x32xf32>
    %92 = arith.divf %90, %91 : vector<1x32xf32>
    %93 = vector.broadcast %92 : vector<1x32xf32> to vector<2x32xf32>
    %94 = arith.subf %88, %93 : vector<2x32xf32>
    %95 = arith.mulf %94, %94 : vector<2x32xf32>
    %cst_33 = arith.constant dense<0.000000e+00> : vector<32xf32>
    %96 = vector.multi_reduction <add>, %95, %cst_33 [0] : vector<2x32xf32> to vector<32xf32>
    %97 = vector.shape_cast %96 : vector<32xf32> to vector<1x32xf32>
    %cst_34 = arith.constant 2.000000e+00 : f32
    %98 = vector.broadcast %cst_34 : f32 to vector<1x32xf32>
    %99 = arith.divf %97, %98 : vector<1x32xf32>
    %100 = vector.broadcast %92 : vector<1x32xf32> to vector<2x32xf32>
    %101 = arith.subf %88, %100 : vector<2x32xf32>
    %cst_35 = arith.constant 9.99999974E-6 : f32
    %102 = vector.broadcast %cst_35 : f32 to vector<1x32xf32>
    %103 = arith.addf %99, %102 : vector<1x32xf32>
    %104 = math.rsqrt %103 : vector<1x32xf32>
    %105 = vector.broadcast %104 : vector<1x32xf32> to vector<2x32xf32>
    %106 = arith.mulf %101, %105 : vector<2x32xf32>
    %c579 = arith.constant 579 : index
    %c0_36 = arith.constant 0 : index
    %107 = vector.load %arg1[%c579, %c0_36] : memref<584x256xf32, #tpu.memory_space<vmem>>, vector<1x32xf32>
    %108 = vector.broadcast %107 : vector<1x32xf32> to vector<2x32xf32>
    %109 = arith.mulf %106, %108 : vector<2x32xf32>
    %c580 = arith.constant 580 : index
    %c0_37 = arith.constant 0 : index
    %110 = vector.load %arg1[%c580, %c0_37] : memref<584x256xf32, #tpu.memory_space<vmem>>, vector<1x32xf32>
    %111 = vector.broadcast %110 : vector<1x32xf32> to vector<2x32xf32>
    %112 = arith.addf %109, %111 : vector<2x32xf32>
    %cst_38 = arith.constant 0.000000e+00 : f32
    %113 = vector.broadcast %cst_38 : f32 to vector<2x32xf32>
    %114 = arith.cmpf oge, %112, %113 : vector<2x32xf32>
    %cst_39 = arith.constant 0.00999999977 : f32
    %115 = vector.broadcast %cst_39 : f32 to vector<2x32xf32>
    %116 = arith.mulf %115, %112 : vector<2x32xf32>
    %117 = arith.select %114, %112, %116 : vector<2x32xi1>, vector<2x32xf32>
    %c544 = arith.constant 544 : index
    %c0_40 = arith.constant 0 : index
    %118 = vector.load %arg1[%c544, %c0_40] : memref<584x256xf32, #tpu.memory_space<vmem>>, vector<32x128xf32>
    %cst_41 = arith.constant dense<0.000000e+00> : vector<2x128xf32>
    %119 = tpu.matmul %117, %118, %cst_41 {dimension_numbers = #tpu.dot_dimension_numbers<[1], [0], [0], [1], [0, 0, 1, 1], [], []>} : vector<2x32xf32>, vector<32x128xf32>, vector<2x128xf32> -> vector<2x128xf32>
    %c581 = arith.constant 581 : index
    %c0_42 = arith.constant 0 : index
    %120 = vector.load %arg1[%c581, %c0_42] : memref<584x256xf32, #tpu.memory_space<vmem>>, vector<1x128xf32>
    %121 = vector.broadcast %120 : vector<1x128xf32> to vector<2x128xf32>
    %122 = arith.addf %119, %121 : vector<2x128xf32>
    %c0_43 = arith.constant 0 : index
    %c0_44 = arith.constant 0 : index
    %123 = vector.load %arg2[%c0_43, %c0_44] : memref<2x128xf32, #tpu.memory_space<vmem>>, vector<2x128xf32>
    tpu.vector_store %arg2[%c0_43, %c0_44], %122 {strides = array<i32>} : memref<2x128xf32, #tpu.memory_space<vmem>>, vector<2x128xf32>,
    return
  }
}

</mosaic_0001>

<bundles_post_ra>
// kernel: mamba_forward.1
= control target key start
LH: loop header
LB: loop body
LE: loop exit
PB: predicated region body
PF: predicated region fallthrough
CT: control target
= control target key end

     0   :  { %7 = vsyncpa [#allocation3], 0  ;;  %s1452_s9 = smov [#allocation2]   ;;  %s1561_s0 = inlined_call_operand.vmem [shape: s32[16,1], index: 0, kind: input, shape index: {}]   ;;  %s1562_s1 = inlined_call_operand.hbm [shape: f32[584,256], index: 1, kind: input, shape index: {}]   ;;  %s1563_s2 = inlined_call_operand.vmem [shape: f32[2,128], index: 2, kind: output, shape index: {}]  }
   0x1   :  { %s15_s10 = sshll.u32 %s1452_s9, 4  ;;  %s1428_s13 = scalar_lea.hbm %s1562_s1, 18688  ;;  %s16_s10 = int_to_ptr.vmem [resolvable:$true] %s15_s10 }
   0x2   :  { %p1429_p0 = scmp.ne.s32.totalorder %s1562_s1, %s1428_s13  ;;  %p1432_p1 = scmp.lt.u32.totalorder %s1428_s13, %s1562_s1 }
   0x4   :  { %p1434_p2 = pnand %p1432_p1, %p1429_p0 }
   0x6   :  { %1437 = shalt.err (!%p1434_p2)
}
   0x7   :  { %s1438_s18 = scalar_lea.vmem %s16_s10, 18688  ;;  %p1443_p4 = scmp.lt.s32.totalorder %s16_s10, %s16_s10 }
   0x8   :  { %p1439_p3 = scmp.ne.s32.totalorder %s16_s10, %s1438_s18  ;;  %p1444_p5 = scmp.lt.s32.totalorder %s1438_s18, %s1438_s18 }
   0xa   :  { %p1445_p6 = por %p1444_p5, %p1443_p4 }
   0xc   :  { %p1446_p7 = pnand %p1445_p6, %p1439_p3 }
   0xe   :  { %1449 = shalt.err (!%p1446_p7)
}
   0xf   :  { %s1453_s19 = smov 256   ;;  %s1454_s20 = smov 16  }
  0x10   :  { %21 = dma.hbm_to_vmem [thread:$0]  %s1562_s1, 18688, %s16_s10, [#allocation3], %s1453_s19, %s1453_s19, %s1454_s20  }
  0x11   :  { %1450 = dma.done.wait [#allocation3], 18688  }
  0x12   :  { %1451 = vsyncadd [#allocation3], 4294948608  ;;  %v1455_v0 = vmov 0   ;;  %v1456_v1 = vmov 0.0   ;;  %v25_v2 = vld [vmem:[%s1561_s0] sm:$0xff]  ;;  %v45_v3 = vld [vmem:[#allocation2 + $0x8] sm:$0xff]  ;;  %v27_v6 = vlaneseq }
  0x13   :  { %1388 = vset.pattern.permute.xlu0 %v1455_v0  ;;  %117 = vmatprep.mubr.f32.mxu0 %v1456_v1  ;;  %v26_v4 = vld [vmem:[%s1561_s0 + $0x8] sm:$0xff]  ;;  %vm46_vm2 = vcmask 64512   ;;  %v144_v15 = vld [vmem:[#allocation2 + $0x10] sm:$0xff]  ;;  %vm148_vm4 = vcmask 130048   ;;  %s1457_s0 = smov 64   ;;  %vm431_vm5 = vcmask 523264  }
  0x14   :  { %31 = vperm.xlu0 %1388, %v25_v2   ;;  %53 = vmatprep.subr.mxu0 %v45_v3  ;;  %v44_v5 = vld [vmem:[#allocation2] sm:$0xff]  ;;  %v28_v7 = vand.u32 127, %v27_v6  ;;  %v146_v17 = vld [vmem:[#allocation2 + $0x30] sm:$0xff]  ;;  %s1458_s1 = smov 112   ;;  %vm1460_vm10 = vmmov 0   ;;  %vm980_vm11 = vcmask 254976  }
  0x15   :  { %54 = vmatpush1.msra.mxu0 %v44_v5  ;;  %1208 = vmatprep.mubr.msk.f32.mxu1 %vm148_vm4, %v144_v15  ;;  %v147_v23 = vld [vmem:[#allocation2 + $0x40] sm:$0xff]  ;;  %v319_v29 = vld [vmem:[#allocation2 + $0x50] sm:$0xff]  ;;  %vm1015_vm13 = vcmask 261120  }
  0x16   :  { %vm29_vm0 = vcmp.eq.s32.totalorder %v28_v7, 5  ;;  %v145_v28 = vld [vmem:[#allocation2 + $0x20] sm:$0xff]  ;;  %v422_v33 = vld [vmem:[#allocation2 + $0x90] sm:$0xff] }
  0x17   :  { %v320_v30 = vld [vmem:[#allocation2 + $0x60] sm:$0xff]  ;;  %v424_v36 = vld [vmem:[#allocation2 + $0xb0] sm:$0xff] }
  0x18   :  { %34 = vperm.xlu0 %1388, %v26_v4   ;;  %v423_v34 = vld [vmem:[#allocation2 + $0xa0] sm:$0xff]  ;;  %v426_v39 = vld [vmem:[#allocation2 + $0xd0] sm:$0xff] }
  0x19   :  { %v1286_v35 = vpack.c.bf16 %v423_v34, %v422_v33  ;;  %v425_v37 = vld [vmem:[#allocation2 + $0xc0] sm:$0xff]  ;;  %v428_v42 = vld [vmem:[#allocation2 + $0xf0] sm:$0xff] }
  0x1a   :  { %v1290_v38 = vpack.c.bf16 %v425_v37, %v424_v36  ;;  %v427_v40 = vld [vmem:[#allocation2 + $0xe0] sm:$0xff]  ;;  %v513_v45 = vld [vmem:[#allocation2 + $0x110] sm:$0xff] }
  0x1b   :  { %v1294_v41 = vpack.c.bf16 %v427_v40, %v426_v39  ;;  %v429_v43 = vld [vmem:[#allocation2 + $0x100] sm:$0xff]  ;;  %v515_v47 = vld [vmem:[#allocation2 + $0x130] sm:$0xff] }
  0x1c   :  { %v1298_v44 = vpack.c.bf16 %v429_v43, %v428_v42  ;;  %v514_v46 = vld [vmem:[#allocation2 + $0x120] sm:$0xff]  ;;  %v517_v51 = vld [vmem:[#allocation2 + $0x150] sm:$0xff]  ;;  %v692_v42 = vld [vmem:[#allocation2 + $0x198] sm:$0xff] }
  0x1d   :  { %v1302_v48 = vpack.c.bf16 %v514_v46, %v513_v45  ;;  %v516_v49 = vld [vmem:[#allocation2 + $0x140] sm:$0xff]  ;;  %v404_v58 = vld [vmem:[#allocation2 + $0x70] sm:$0xff]  ;;  %v694_v43 = vld [vmem:[#allocation2 + $0x1a8] sm:$0xff] }
  0x1e   :  { %v1306_v50 = vpack.c.bf16 %v516_v49, %v515_v47  ;;  %v518_v52 = vld [vmem:[#allocation2 + $0x160] sm:$0xff]  ;;  %v691_v45 = vld [vmem:[#allocation2 + $0x190] sm:$0xff]  ;;  %v698_v49 = vld [vmem:[#allocation2 + $0x1c8] sm:$0xff] }
  0x1f   :  { %v1310_v53 = vpack.c.bf16 %v518_v52, %v517_v51  ;;  %v405_v55 = vld [vmem:[#allocation2 + $0x80] sm:$0xff]  ;;  %v695_v51 = vld [vmem:[#allocation2 + $0x1b0] sm:$0xff] }
  0x20   :  { %v693_v46 = vld [vmem:[#allocation2 + $0x1a0] sm:$0xff] }
  0x21   :  { %v1320_v47 = vpack.c.bf16 %v693_v46, %v691_v45  ;;  %v810_v46 = vld [vmem:[#allocation2 + $0x2f0] sm:$0xff] }
  0x93   :  { %v32_v8 = vpop.permute.xlu0 %31 }
  0x94   :  { %vm36_vm1 = vcmp.eq.s32.totalorder %v32_v8, %v28_v7 }
  0x95   :  { %v1095_v9 = vsel %vm36_vm1, 1.0, %v1456_v1 }
  0x96   :  { %v42_v10 = vsel %vm29_vm0, 1.0, %v1095_v9  ;;  %v519_v9 = vld [vmem:[#allocation2 + $0x170] sm:$0xff] }
  0x97   :  { %1097 = vmatmul.mubr.msk.f32.vlgmr.msra.gmra.mrb[0].mxu0 %vm46_vm2, %v42_v10  ;;  %v35_v11 = vpop.permute.xlu0 %34  ;;  %v520_v10 = vld [vmem:[#allocation2 + $0x180] sm:$0xff] }
  0x98   :  { %vm37_vm3 = vcmp.eq.s32.totalorder %v35_v11, %v28_v7  ;;  %123 = vmatprep.mubr.f32.mxu0 %v1456_v1  ;;  %v1314_v11 = vpack.c.bf16 %v520_v10, %v519_v9  ;;  %v800_v10 = vld [vmem:[#allocation2 + $0x250] sm:$0xff] }
  0x99   :  { %v1096_v12 = vsel %vm37_vm3, 1.0, %v1456_v1 }
  0x9a   :  { %v43_v13 = vsel %vm29_vm0, 1.0, %v1096_v12  ;;  %v430_v12 = vld [vmem:[#allocation2 + $0x480] ss:$0 sm:$0xff] }
  0x9b   :  { %1098 = vmatmul.mubr.msk.f32.gmra.mrb[2].mxu0 %vm46_vm2, %v43_v13 }
  0x9c   :  { %1201 = vmatprep.mubr.msk.f32.mxu0 %vm148_vm4, %v146_v17 }
 0x16a   :  { %v119_v14 = vpop.f32.mrb[0].mxu0 }
 0x16b   :  { %v1498_v16 = vpop.f32.mrb[1].mxu0 }
 0x16e   :  { %v125_v18 = vpop.f32.mrb[2].mxu0 }
 0x16f   :  { %v1274_v19 = vpack.c.bf16 %v125_v18, %v119_v14  ;;  %v1502_v20 = vpop.f32.mrb[3].mxu0  ;;  %v1389_v21 = vpack.i.bf16 %v125_v18, %v119_v14  ;;  %v521_v18 = vld [vmem:[#allocation2 + $0x481] ss:$0 sm:$0xff] }
 0x170   :  { %v1282_v22 = vpack.c.bf16 %v1502_v20, %v1498_v16 }
 0x171   :  { %1390 = vrot.lane.b32.xlu1 %v1389_v21, %s1457_s0  ;;  %1275 = vmatprep.subr.bf16.mxu0 %v1274_v19 }
 0x172   :  { %1277 = vmatpush3.bf16.msra.mxu0 %v1274_v19 }
 0x173   :  { %1287 = vmatprep.subr.bf16.mxu0 %v1286_v35 }
 0x175   :  { %1202 = vmatmul.mubr.msk.f32.vlgmr.msra.gmra.mrb[4].mxu0 %vm148_vm4, %v147_v23 }
 0x176   :  { %1289 = vmatpush3.bf16.msra.mxu0 %v1286_v35 }
 0x177   :  { %1291 = vmatprep.subr.bf16.mxu0 %v1290_v38 }
 0x17a   :  { %1293 = vmatpush3.bf16.msra.mxu0 %v1290_v38 }
 0x17b   :  { %1295 = vmatprep.subr.bf16.mxu0 %v1294_v41 }
 0x17e   :  { %1297 = vmatpush3.bf16.msra.mxu0 %v1294_v41 }
 0x17f   :  { %1299 = vmatprep.subr.bf16.mxu0 %v1298_v44 }
 0x182   :  { %1301 = vmatpush3.bf16.msra.mxu0 %v1298_v44  ;;  %v1318_v44 = vpack.c.bf16 %v694_v43, %v692_v42  ;;  %v826_v42 = vld [vmem:[#allocation2 + $0x3f0] sm:$0xff]  ;;  %v827_v43 = vld [vmem:[#allocation2 + $0x400] sm:$0xff] }
 0x183   :  { %v1358_v45 = vpack.c.bf16 %v827_v43, %v826_v42  ;;  %v791_v42 = vld [vmem:[#allocation2 + $0x218] sm:$0xff] }
 0x184   :  { %1319 = vmatprep.subr.bf16.mxu0 %v1318_v44 }
 0x1e3   :  { %v1391_v24 = vpop.permute.xlu1 %1390 }
 0x1e4   :  { %v1393_v25 = vunpack.i.h.bf16 %v1391_v24  ;;  %v1392_v26 = vunpack.i.l.bf16 %v1391_v24 }
 0x1e6   :  { %v1278_v27 = vpack.c.bf16 %v1393_v25, %v1392_v26 }
 0x1e8   :  { %1279 = vmatprep.subr.bf16.mxu1 %v1278_v27 }
 0x1e9   :  { %1281 = vmatpush3.bf16.msra.mxu1 %v1278_v27 }
 0x1ea   :  { %1283 = vmatprep.subr.bf16.mxu1 %v1282_v22 }
 0x1ec   :  { %1209 = vmatmul.mubr.msk.f32.vlgmr.msra.gmra.mrb[0].mxu1 %vm148_vm4, %v145_v28  ;;  %v1100_v28 = vmul.f32 -1.442695, %v1502_v20 }
 0x1ed   :  { %1285 = vmatpush3.bf16.msra.mxu1 %v1282_v22  ;;  %1215 = vmatprep.mubr.msk.f32.mxu1 %vm148_vm4, %v319_v29  ;;  %v1099_v29 = vmul.f32 -1.442695, %v1498_v16 }
 0x1ee   :  { %1303 = vmatprep.subr.bf16.mxu1 %v1302_v48 }
 0x1f4   :  { %1216 = vmatmul.mubr.msk.f32.vlgmr.msra.gmra.mrb[0].mxu1 %vm148_vm4, %v320_v30 }
 0x1f5   :  { %1305 = vmatpush3.bf16.msra.mxu1 %v1302_v48  ;;  %v696_v48 = vld [vmem:[#allocation2 + $0x1b8] sm:$0xff] }
 0x1f6   :  { %1307 = vmatprep.subr.bf16.mxu1 %v1306_v50 }
 0x1f9   :  { %1309 = vmatpush3.bf16.msra.mxu1 %v1306_v50  ;;  %v1322_v50 = vpack.c.bf16 %v698_v49, %v696_v48 }
 0x1fa   :  { %1311 = vmatprep.subr.bf16.mxu1 %v1310_v53 }
 0x1fd   :  { %1313 = vmatpush3.bf16.msra.mxu1 %v1310_v53  ;;  %v700_v53 = vld [vmem:[#allocation2 + $0x1d8] sm:$0xff] }
 0x1fe   :  { %1315 = vmatprep.subr.bf16.mxu1 %v1314_v11 }
 0x201   :  { %1317 = vmatpush3.bf16.msra.mxu1 %v1314_v11  ;;  %v801_v11 = vld [vmem:[#allocation2 + $0x260] sm:$0xff] }
 0x248   :  { %v1203_v31 = vpop.f32.mrb[4].mxu0 }
 0x249   :  { %v221_v32 = vpop.f32.mrb[5].mxu0 }
 0x2c7   :  { %v1217_v54 = vpop.f32.mrb[0].mxu1 }
 0x2c8   :  { %v1375_v56 = vadd.f32 %v1217_v54, %v1203_v31  ;;  %v393_v57 = vpop.f32.mrb[1].mxu1 }
 0x2c9   :  { %v1376_v59 = vadd.f32 %v393_v57, %v221_v32 }
 0x2ca   :  { %v407_v60 = vadd.f32 %v1375_v56, %v405_v55  ;;  %v699_v55 = vld [vmem:[#allocation2 + $0x1d0] sm:$0xff]  ;;  %v701_v56 = vld [vmem:[#allocation2 + $0x1e0] sm:$0xff] }
 0x2cb   :  { %v406_v61 = vadd.f32 %v1376_v59, %v404_v58  ;;  %v1328_v57 = vpack.c.bf16 %v701_v56, %v699_v55  ;;  %v704_v58 = vld [vmem:[#allocation2 + $0x1f8] sm:$0xff]  ;;  %v706_v59 = vld [vmem:[#allocation2 + $0x208] sm:$0xff] }
 0x2cc   :  { %v1108_v62 = vmul.f32 -1.442695, %v407_v60 }
 0x2cd   :  { %v1107_v63 = vmul.f32 -1.442695, %v406_v61 }
 0x2ce   :  { %1394 = vpow2.f32 %v1108_v62  ;;  %v705_v62 = vld [vmem:[#allocation2 + $0x200] sm:$0xff] }
 0x2cf   :  { %1396 = vpow2.f32 %v1107_v63 }
 0x2d8   :  { %v1395_v0 = vpop.eup %1394 }
 0x2d9   :  { %v1397_v2 = vpop.eup %1396  ;;  %v415_v3 = vadd.f32 1.0, %v1395_v0  ;;  %v814_v0 = vld [vmem:[#allocation2 + $0x330] sm:$0xff] }
 0x2da   :  { %v414_v4 = vadd.f32 1.0, %v1397_v2  ;;  %v815_v2 = vld [vmem:[#allocation2 + $0x340] sm:$0xff] }
 0x2db   :  { %1398 = vrcp.f32 %v415_v3  ;;  %v798_v3 = vld [vmem:[#allocation2 + $0x230] sm:$0xff] }
 0x2dc   :  { %1400 = vrcp.f32 %v414_v4  ;;  %v1334_v4 = vpack.c.bf16 %v815_v2, %v814_v0 }
 0x2dd   :  { %1402 = vpow2.f32 %v1100_v28  ;;  %v804_v28 = vld [vmem:[#allocation2 + $0x290] sm:$0xff] }
 0x2de   :  { %1404 = vpow2.f32 %v1099_v29  ;;  %1335 = vmatprep.subr.bf16.mxu1 %v1334_v4  ;;  %v805_v29 = vld [vmem:[#allocation2 + $0x2a0] sm:$0xff] }
 0x2e5   :  { %v1399_v5 = vpop.eup %1398 }
 0x2e6   :  { %v1401_v6 = vpop.eup %1400  ;;  %v421_v8 = vmul.f32 %v1399_v5, %v407_v60  ;;  %v1330_v60 = vpack.c.bf16 %v706_v59, %v704_v58  ;;  %v799_v5 = vld [vmem:[#allocation2 + $0x240] sm:$0xff] }
 0x2e7   :  { %v420_v7 = vmul.f32 %v1401_v6, %v406_v61  ;;  %v1403_v30 = vpop.eup %1402  ;;  %v703_v61 = vld [vmem:[#allocation2 + $0x1f0] sm:$0xff] }
 0x2e8   :  { %v137_v32 = vadd.f32 1.0, %v1403_v30  ;;  %v1405_v35 = vpop.eup %1404  ;;  %v1332_v63 = vpack.c.bf16 %v705_v62, %v703_v61  ;;  %v816_v6 = vld [vmem:[#allocation2 + $0x350] sm:$0xff] }
 0x2e9   :  { %1234 = vmatprep.mubr.msk.f32.mxu0 %vm431_vm5, %v420_v7  ;;  %v136_v37 = vadd.f32 1.0, %v1405_v35  ;;  %v817_v7 = vld [vmem:[#allocation2 + $0x360] sm:$0xff]  ;;  %v822_v30 = vld [vmem:[#allocation2 + $0x3b0] sm:$0xff] }
 0x2ea   :  { %1235 = vmatmul.mubr.msk.f32.vlgmr.msra.gmra.mrb[6].mxu0 %vm431_vm5, %v421_v8  ;;  %1406 = vrcp.f32 %v137_v32  ;;  %v1336_v8 = vpack.c.bf16 %v799_v5, %v798_v3  ;;  %v1338_v9 = vpack.c.bf16 %v817_v7, %v816_v6  ;;  %v1348_v32 = vpack.c.bf16 %v805_v29, %v804_v28  ;;  %v807_v35 = vld [vmem:[#allocation2 + $0x2c0] sm:$0xff] }
 0x2eb   :  { %777 = vmatprep.mubr.f32.mxu0 %v1456_v1  ;;  %1408 = vrcp.f32 %v136_v37  ;;  %1321 = vmatpush1.bf16.msra.mxu0 %v1320_v47  ;;  %v825_v37 = vld [vmem:[#allocation2 + $0x3e0] sm:$0xff] }
 0x2ec   :  { %1323 = vmatprep.subr.bf16.mxu0 %v1322_v50  ;;  %v811_v47 = vld [vmem:[#allocation2 + $0x300] sm:$0xff] }
 0x2ed   :  { %v1360_v48 = vpack.c.bf16 %v811_v47, %v810_v46 }
 0x2f4   :  { %v1407_v38 = vpop.eup %1406 }
 0x2f5   :  { %v143_v39 = vmul.f32 %v1407_v38, %v1502_v20  ;;  %v1409_v40 = vpop.eup %1408  ;;  %v697_v20 = vld [vmem:[#allocation2 + $0x1c0] sm:$0xff] }
 0x2f6   :  { %v142_v41 = vmul.f32 %v1409_v40, %v1498_v16  ;;  %v1324_v52 = vpack.c.bf16 %v697_v20, %v695_v51  ;;  %v702_v16 = vld [vmem:[#allocation2 + $0x1e8] sm:$0xff]  ;;  %v808_v40 = vld [vmem:[#allocation2 + $0x2d0] sm:$0xff] }
 0x2f7   :  { %v1326_v54 = vpack.c.bf16 %v702_v16, %v700_v53 }
 0x2f8   :  { %1325 = vmatpush1.bf16.msra.mxu0 %v1324_v52 }
 0x2f9   :  { %1327 = vmatprep.subr.bf16.mxu0 %v1326_v54 }
 0x2fc   :  { %1329 = vmatpush1.bf16.msra.mxu0 %v1328_v57 }
 0x2fd   :  { %1331 = vmatprep.subr.bf16.mxu0 %v1330_v60 }
 0x300   :  { %1333 = vmatpush1.bf16.msra.mxu0 %v1332_v63 }
 0x3bd   :  { %v1236_v13 = vpop.f32.mrb[6].mxu0 }
 0x3be   :  { %v504_v14 = vpop.f32.mrb[7].mxu0  ;;  %v1516_v17 = vadd.f32 %v1236_v13, %v430_v12  ;;  %v819_v13 = vld [vmem:[#allocation2 + $0x380] sm:$0xff] }
 0x3bf   :  { %v1514_v15 = vadd.f32 %v504_v14, %v430_v12  ;;  %v818_v12 = vld [vmem:[#allocation2 + $0x370] sm:$0xff]  ;;  %v1340_v14 = vpack.c.bf16 %v801_v11, %v800_v10 }
 0x3c1   :  { %1253 = vmatprep.mubr.msk.f32.mxu1 %vm431_vm5, %v1514_v15 }
 0x3c2   :  { %1254 = vmatmul.mubr.msk.f32.vlgmr.msra.gmra.mrb[2].mxu1 %vm431_vm5, %v1516_v17 }
 0x3c3   :  { %1337 = vmatpush3.bf16.msra.mxu1 %v1336_v8 }
 0x3c4   :  { %1339 = vmatprep.subr.bf16.mxu1 %v1338_v9 }
 0x3c7   :  { %1341 = vmatpush3.bf16.msra.mxu1 %v1340_v14 }
 0x495   :  { %v1255_v19 = vpop.f32.mrb[2].mxu1 }
 0x496   :  { %v1522_v21 = vadd.f32 %v1255_v19, %v521_v18  ;;  %v594_v22 = vpop.f32.mrb[3].mxu1  ;;  %v802_v19 = vld [vmem:[#allocation2 + $0x270] sm:$0xff] }
 0x497   :  { %v1524_v23 = vadd.f32 %v594_v22, %v521_v18  ;;  %v1342_v18 = vpack.c.bf16 %v819_v13, %v818_v12  ;;  %v803_v22 = vld [vmem:[#allocation2 + $0x280] sm:$0xff] }
 0x498   :  { %643 = vrot.lane.b32.xlu0 %v1522_v21, %s1458_s1  ;;  %v610_v49 = vand.u32 2147483647, %v1522_v21  ;;  %v604_v7 = vmax.f32 %v1522_v21, 0.0  ;;  %vm606_vm8 = vcmp.ne.f32.partialorder %v1522_v21, %v1522_v21 }
 0x499   :  { %641 = vrot.lane.b32.xlu1 %v1524_v23, %s1458_s1  ;;  %1343 = vmatprep.subr.bf16.mxu1 %v1342_v18  ;;  %v609_v50 = vand.u32 2147483647, %v1524_v23  ;;  %v603_v9 = vmax.f32 %v1524_v23, 0.0  ;;  %vm605_vm9 = vcmp.ne.f32.partialorder %v1524_v23, %v1524_v23 }
 0x49a   :  { %v612_v51 = vsub.f32 0.0, %v610_v49 }
 0x49b   :  { %v611_v20 = vsub.f32 0.0, %v609_v50  ;;  %v792_v50 = vld [vmem:[#allocation2 + $0x220] sm:$0xff] }
 0x49c   :  { %v615_v52 = vmul.f32 1.442695, %v612_v51 }
 0x49d   :  { %v613_v53 = vmul.f32 1.442695, %v611_v20 }
 0x49e   :  { %1410 = vpow2.f32 %v615_v52 }
 0x49f   :  { %1412 = vpow2.f32 %v613_v53  ;;  %v1459_v53 = vmov 0.0|0.0  }
 0x4a0   :  { %1366 = vmatprep.subr.bf16.mxu0 %v1459_v53 }
 0x4a8   :  { %v1411_v16 = vpop.eup %1410 }
 0x4a9   :  { %v1413_v54 = vpop.eup %1412  ;;  %v626_v55 = vadd.f32 1.0, %v1411_v16  ;;  %v629_v57 = vmul.f32 -0.5, %v1411_v16  ;;  %v632_v62 = vand.u32 2147483647, %v1411_v16 }
 0x4aa   :  { %v617_v56 = vadd.f32 1.0, %v1413_v54  ;;  %v620_v58 = vmul.f32 -0.5, %v1413_v54  ;;  %v623_v2 = vand.u32 2147483647, %v1413_v54 }
 0x4ab   :  { %1414 = vlog2.f32 %v626_v55  ;;  %v630_v61 = vadd.f32 1.0, %v629_v57  ;;  %vm633_vm6 = vcmp.lt.f32.partialorder %v632_v62, 0.0004427343  ;;  %v1011_v62 = vld [vmem:[#allocation2 + $0x450] sm:$0xff] }
 0x4ac   :  { %1416 = vlog2.f32 %v617_v56  ;;  %v621_v63 = vadd.f32 1.0, %v620_v58  ;;  %vm624_vm7 = vcmp.lt.f32.partialorder %v623_v2, 0.0004427343  ;;  %v1013_v2 = vld [vmem:[#allocation2 + $0x470] sm:$0xff] }
 0x4ad   :  { %v631_v4 = vmul.f32 %v1411_v16, %v630_v61  ;;  %v1010_v61 = vld [vmem:[#allocation2 + $0x440] sm:$0xff] }
 0x4ae   :  { %v622_v5 = vmul.f32 %v1413_v54, %v621_v63  ;;  %v1370_v63 = vpack.c.bf16 %v1011_v62, %v1010_v61 }
 0x4b5   :  { %v1415_v59 = vpop.eup %1414 }
 0x4b6   :  { %v1417_v60 = vpop.eup %1416  ;;  %v628_v0 = vmul.f32 0.6931472, %v1415_v59 }
 0x4b7   :  { %v619_v3 = vmul.f32 0.6931472, %v1417_v60  ;;  %v905_v60 = vld [vmem:[#allocation2 + $0x430] sm:$0x3] }
 0x4b8   :  { %v634_v6 = vsel %vm633_vm6, %v631_v4, %v628_v0  ;;  %v1012_v0 = vld [vmem:[#allocation2 + $0x460] sm:$0xff] }
 0x4b9   :  { %v625_v8 = vsel %vm624_vm7, %v622_v5, %v619_v3  ;;  %v636_v10 = vadd.f32 %v634_v6, %v604_v7  ;;  %v1373_v3 = vpack.c.bf16 %v1013_v2, %v1012_v0  ;;  %v906_v4 = vld [vmem:[#allocation2 + $0x482] ss:$0 sm:$0xff] }
 0x4ba   :  { %v635_v11 = vadd.f32 %v625_v8, %v603_v9 }
 0x4bb   :  { %v638_v12 = vsel %vm606_vm8, %v1522_v21, %v636_v10 }
 0x4bc   :  { %v637_v13 = vsel %vm605_vm9, %v1524_v23, %v635_v11  ;;  %v664_v14 = vmul.f32 %v638_v12, %v1516_v17 }
 0x50a   :  { %v644_v24 = vpop.permute.xlu0 %643 }
 0x50b   :  { %v648_v25 = vmul.f32 %v644_v24, %v1522_v21  ;;  %v642_v26 = vpop.permute.xlu1 %641  ;;  %v820_v24 = vld [vmem:[#allocation2 + $0x390] sm:$0xff] }
 0x50c   :  { %v647_v27 = vmul.f32 %v642_v26, %v1524_v23  ;;  %v1344_v26 = vpack.c.bf16 %v803_v22, %v802_v19  ;;  %v663_v19 = vmul.f32 %v637_v13, %v1514_v15 }
 0x50d   :  { %653 = vrot.lane.b32.xlu0 %v648_v25, %s1457_s0  ;;  %v821_v25 = vld [vmem:[#allocation2 + $0x3a0] sm:$0xff] }
 0x50e   :  { %651 = vrot.lane.b32.xlu1 %v647_v27, %s1457_s0  ;;  %v1346_v27 = vpack.c.bf16 %v821_v25, %v820_v24  ;;  %1345 = vmatpush3.bf16.msra.mxu1 %v1344_v26 }
 0x510   :  { %1347 = vmatprep.subr.bf16.mxu1 %v1346_v27 }
 0x512   :  { %1349 = vmatpush3.bf16.msra.mxu1 %v1348_v32 }
 0x57f   :  { %v654_v31 = vpop.permute.xlu0 %653 }
 0x580   :  { %v652_v33 = vpop.permute.xlu1 %651  ;;  %v660_v34 = vsel %vm148_vm4, %v654_v31, 0.0  ;;  %v823_v31 = vld [vmem:[#allocation2 + $0x3c0] sm:$0xff] }
 0x581   :  { %661 = vadd.xlane.f32.xlu0 %v660_v34  ;;  %v657_v36 = vsel %vm148_vm4, %v652_v33, 0.0  ;;  %v1350_v33 = vpack.c.bf16 %v823_v31, %v822_v30  ;;  %v806_v34 = vld [vmem:[#allocation2 + $0x2b0] sm:$0xff] }
 0x582   :  { %658 = vadd.xlane.f32.xlu1 %v657_v36  ;;  %v824_v36 = vld [vmem:[#allocation2 + $0x3d0] sm:$0xff]  ;;  %v1352_v38 = vpack.c.bf16 %v807_v35, %v806_v34 }
 0x583   :  { %1351 = vmatprep.subr.bf16.mxu1 %v1350_v33 }
 0x584   :  { %1353 = vmatpush3.bf16.msra.mxu1 %v1352_v38 }
 0x593   :  { %685 = vrot.lane.b32.xlu1 %v143_v39, %s1457_s0  ;;  %v1354_v39 = vpack.c.bf16 %v825_v37, %v824_v36  ;;  %v828_v36 = vld [vmem:[#allocation2 + $0x410] sm:$0xff]  ;;  %v829_v37 = vld [vmem:[#allocation2 + $0x420] sm:$0xff] }
 0x594   :  { %v1362_v38 = vpack.c.bf16 %v829_v37, %v828_v36  ;;  %v1014_v36 = vld [vmem:[#allocation2 + $0x485] ss:$0 sm:$0xff] }
 0x595   :  { %1355 = vmatprep.subr.bf16.mxu1 %v1354_v39  ;;  %v812_v39 = vld [vmem:[#allocation2 + $0x310] sm:$0xff] }
 0x597   :  { %683 = vrot.lane.b32.xlu0 %v142_v41, %s1457_s0  ;;  %v809_v41 = vld [vmem:[#allocation2 + $0x2e0] sm:$0xff] }
 0x598   :  { %v1356_v44 = vpack.c.bf16 %v809_v41, %v808_v40  ;;  %v813_v40 = vld [vmem:[#allocation2 + $0x320] sm:$0xff] }
 0x599   :  { %v1364_v41 = vpack.c.bf16 %v813_v40, %v812_v39 }
 0x59a   :  { %1357 = vmatpush3.bf16.msra.mxu1 %v1356_v44  ;;  %v790_v44 = vld [vmem:[#allocation2 + $0x210] sm:$0xff] }
 0x59b   :  { %1359 = vmatprep.subr.bf16.mxu1 %v1358_v45 }
 0x59e   :  { %1361 = vmatpush3.bf16.msra.mxu1 %v1360_v48  ;;  %v793_v48 = vld [vmem:[#allocation2 + $0x228] sm:$0xff] }
 0x59f   :  { %1363 = vmatprep.subr.bf16.mxu1 %v1362_v38 }
 0x5a2   :  { %1365 = vmatpush3.bf16.msra.mxu1 %v1364_v41 }
 0x60e   :  { %v662_v18 = vpop.xlane.xlu0 %661 }
 0x60f   :  { %v666_v22 = vmul.f32 %v664_v14, %v662_v18  ;;  %v659_v24 = vpop.xlane.xlu1 %658 }
 0x610   :  { %v665_v25 = vmul.f32 %v663_v19, %v659_v24 }
 0x611   :  { %v1114_v26 = vmul.f32 -1.442695, %v666_v22 }
 0x612   :  { %v1113_v27 = vmul.f32 -1.442695, %v665_v25  ;;  %v684_v17 = vpop.permute.xlu0 %683 }
 0x613   :  { %1418 = vpow2.f32 %v1114_v26  ;;  %v686_v15 = vpop.permute.xlu1 %685 }
 0x614   :  { %1420 = vpow2.f32 %v1113_v27 }
 0x61d   :  { %v1419_v28 = vpop.eup %1418 }
 0x61e   :  { %v1421_v29 = vpop.eup %1420  ;;  %v674_v21 = vadd.f32 1.0, %v1419_v28 }
 0x61f   :  { %v673_v30 = vadd.f32 1.0, %v1421_v29 }
 0x620   :  { %1422 = vrcp.f32 %v674_v21 }
 0x621   :  { %1424 = vrcp.f32 %v673_v30 }
 0x62a   :  { %v1423_v31 = vpop.eup %1422 }
 0x62b   :  { %v1425_v23 = vpop.eup %1424  ;;  %v680_v34 = vmul.f32 %v1423_v31, %v666_v22 }
 0x62c   :  { %v679_v32 = vmul.f32 %v1425_v23, %v665_v25  ;;  %v1003_v23 = vld [vmem:[#allocation2 + $0x483] ss:$0 sm:$0xff] }
 0x62d   :  { %v690_v35 = vmul.f32 %v686_v15, %v680_v34 }
 0x62e   :  { %v689_v33 = vmul.f32 %v684_v17, %v679_v32  ;;  %v1005_v17 = vld [vmem:[#allocation2 + $0x484] ss:$0 sm:$0xff] }
 0x630   :  { %1115 = vmatmul.mubr.msk.f32.vlgmr.msra.gmra.mrb[8].mxu0 %vm431_vm5, %v689_v33 }
 0x631   :  { %783 = vmatprep.mubr.f32.mxu0 %v1456_v1 }
 0x634   :  { %1116 = vmatmul.mubr.msk.f32.gmra.mrb[10].mxu0 %vm431_vm5, %v690_v35 }
 0x635   :  { %1260 = vmatprep.mubr.msk.f32.mxu0 %vm1460_vm10, %v1456_v1 }
 0x703   :  { %v779_v43 = vpop.f32.mrb[8].mxu0 }
 0x704   :  { %v781_v45 = vpop.f32.mrb[9].mxu0  ;;  %v794_v47 = vmul.f32 %v790_v44, %v779_v43 }
 0x705   :  { %v795_v46 = vmul.f32 %v791_v42, %v781_v45 }
 0x707   :  { %v785_v49 = vpop.f32.mrb[10].mxu0  ;;  %894 = vmatprep.mubr.f32.mxu1 %v795_v46 }
 0x708   :  { %v787_v51 = vpop.f32.mrb[11].mxu0  ;;  %895 = vmatmul.mubr.f32.vlgmr.msra.gmra.mrb[4].mxu1 %v794_v47  ;;  %v796_v52 = vmul.f32 %v792_v50, %v785_v49 }
 0x709   :  { %v797_v20 = vmul.f32 %v793_v48, %v787_v51 }
 0x70b   :  { %899 = vmatprep.mubr.f32.mxu1 %v797_v20 }
 0x70c   :  { %900 = vmatmul.mubr.f32.gmra.mrb[6].mxu1 %v796_v52 }
 0x7db   :  { %v1183_v16 = vpop.f32.mrb[4].mxu1 }
 0x7dc   :  { %v1184_v54 = vpop.f32.mrb[5].mxu1 }
 0x7dd   :  { %v1185_v55 = vadd.f32 %v1184_v54, %v1183_v16 }
 0x7df   :  { %v1186_v56 = vpop.f32.mrb[6].mxu1 }
 0x7e0   :  { %v1187_v57 = vpop.f32.mrb[7].mxu1 }
 0x7e1   :  { %v1188_v58 = vadd.f32 %v1187_v57, %v1186_v56 }
 0x7e3   :  { %v1367_v59 = vpack.c.bf16 %v1188_v58, %v1185_v55 }
 0x7e5   :  { %1368 = vmatpush3.bf16.msra.mxu0 %v1367_v59 }
 0x7e6   :  { %1369 = vmatprep.subr.bf16.mxu0 %v1459_v53 }
 0x7e8   :  { %1261 = vmatmul.mubr.msk.f32.vlgmr.msra.gmra.mrb[12].mxu0 %vm148_vm4, %v905_v60 }
 0x7e9   :  { %1271 = vmatprep.mubr.msk.f32.mxu0 %vm1460_vm10, %v1456_v1  ;;  %1371 = vmatpush3.bf16.msra.mxu0 %v1370_v63 }
 0x7ea   :  { %1372 = vmatprep.subr.bf16.mxu0 %v1459_v53 }
 0x7ed   :  { %1374 = vmatpush3.bf16.msra.mxu0 %v1373_v3 }
 0x8bb   :  { %v976_v5 = vpop.f32.mrb[12].mxu0 }
 0x8bc   :  { %v977_v6 = vadd.f32 %v976_v5, %v906_v4  ;;  %v1262_v7 = vpop.f32.mrb[13].mxu0 }
 0x8be   :  { %v981_v8 = vsel %vm980_vm11, %v977_v6, 0.0 }
 0x8bf   :  { %v982_v9 = vrot.slane %v981_v8, 4 }
 0x8c1   :  { %v983_v10 = vadd.f32 %v982_v9, %v981_v8 }
 0x8c3   :  { %v984_v11 = vrot.slane %v983_v10, 2 }
 0x8c5   :  { %v985_v12 = vadd.f32 %v984_v11, %v983_v10 }
 0x8c7   :  { %v986_v1 = vrot.slane %v985_v12, 1 }
 0x8c9   :  { %v987_v13 = vadd.f32 %v986_v1, %v985_v12 }
 0x8cb   :  { %v989_v14 = vmul.f32 0.5, %v987_v13 }
 0x8cd   :  { %v990_v18 = vsub.f32 %v977_v6, %v989_v14 }
 0x8cf   :  { %v991_v19 = vmul.f32 %v990_v18, %v990_v18 }
 0x8d1   :  { %v992_v22 = vsel %vm980_vm11, %v991_v19, 0.0 }
 0x8d2   :  { %v993_v24 = vrot.slane %v992_v22, 4 }
 0x8d4   :  { %v994_v25 = vadd.f32 %v993_v24, %v992_v22 }
 0x8d6   :  { %v995_v26 = vrot.slane %v994_v25, 2 }
 0x8d8   :  { %v996_v27 = vadd.f32 %v995_v26, %v994_v25 }
 0x8da   :  { %v997_v28 = vrot.slane %v996_v27, 1 }
 0x8dc   :  { %v998_v29 = vadd.f32 %v997_v28, %v996_v27 }
 0x8de   :  { %v999_v21 = vmul.f32 0.5, %v998_v29 }
 0x8e0   :  { %v1000_v30 = vadd.f32 1e-05, %v999_v21 }
 0x8e2   :  { %1426 = vrsqrt.f32 %v1000_v30 }
 0x8ec   :  { %v1427_v31 = vpop.eup %1426 }
 0x8ed   :  { %v1002_v32 = vmul.f32 %v1427_v31, %v990_v18 }
 0x8ef   :  { %v1004_v33 = vmul.f32 %v1003_v23, %v1002_v32 }
 0x8f1   :  { %v1006_v34 = vadd.f32 %v1005_v17, %v1004_v33 }
 0x8f3   :  { %vm1007_vm12 = vcmp.ge.f32.partialorder %v1006_v34, 0.0  ;;  %v1008_v15 = vmul.f32 0.01, %v1006_v34 }
 0x8f5   :  { %v1009_v35 = vsel %vm1007_vm12, %v1006_v34, %v1008_v15 }
 0x8f6   :  { %1272 = vmatmul.mubr.msk.f32.vlgmr.msra.gmra.mrb[14].mxu0 %vm1015_vm13, %v1009_v35 }
 0x9c9   :  { %v1085_v37 = vpop.f32.mrb[14].mxu0 }
 0x9ca   :  { %v1086_v38 = vadd.f32 %v1085_v37, %v1014_v36  ;;  %v1273_v39 = vpop.f32.mrb[15].mxu0 }
 0x9cc   :  { %1089 = vst [vmem:[%s1563_s2] sm:$0x3] %v1086_v38 }
 0x9cd   :  { %1094 = vsyncpa [#allocation3], 1 }

</bundles_post_ra>
